<compile_context>
chip_gen: v7x
topology: tpu7x:2x2x1
jax: 0.10.0
libtpu: 0.0.40
codegen_flags: <defaults>
</compile_context>

<pallas_src>
import jax
import jax.numpy as jnp
from jax.experimental import pallas as pl
from jax.experimental.pallas import tpu as pltpu

LN_EPS = 1e-5  # nn.LayerNorm default


def _round_up(n, m):
    return (n + m - 1) // m * m


# ---------------------------------------------------------------------------
# Import-time hardware / capability probes (no per-call cost).
# ---------------------------------------------------------------------------
try:
    _VMEM_BYTES = int(getattr(pltpu.get_tpu_info(), "vmem_capacity_bytes",
                              64 * 1024 * 1024))
except Exception:
    _VMEM_BYTES = 64 * 1024 * 1024  # conservative (v7x) default

# 64 MiB VMEM => v7x (2 TensorCores, tighter tile cap); 128 MiB => v5e/v6e.
if _VMEM_BYTES < 100 * 1024 * 1024:
    _TB_CAP = 2048
    _MULTI_TC = True
else:
    _TB_CAP = 4096
    _MULTI_TC = False

try:
    pl.BlockSpec((8, 128), lambda i: (0, 0), pipeline_mode=pl.Buffered(1))
    _HAS_BUFFERED = True
except Exception:
    _HAS_BUFFERED = False


# ---------------------------------------------------------------------------
# Kernel
# ---------------------------------------------------------------------------
def classifier_kernel(x_ref, w1_ref, vec_ref, w2_ref, b2_ref, o_ref):
    # fc1: (TB, D) @ (D, H) on the MXU; x cast to bf16 in-kernel, f32 accum.
    x = x_ref[...].astype(w1_ref.dtype)
    h = jnp.dot(x, w1_ref[...], preferred_element_type=jnp.float32)
    h = h + vec_ref[0:1, :]                    # b1

    # LayerNorm over hidden dim (f32 math).
    mean = jnp.mean(h, axis=-1, keepdims=True)
    cent = h - mean
    var = jnp.mean(cent * cent, axis=-1, keepdims=True)
    h = cent * jax.lax.rsqrt(var + LN_EPS)
    h = h * vec_ref[1:2, :] + vec_ref[2:3, :]  # gamma, beta

    # ReLU
    h = jnp.maximum(h, 0.0)

    # Dropout: inference mode -> identity.

    # fc2: (TB, H) @ (H, Lp) on the MXU; bf16 operands, f32 accum.
    out = jnp.dot(h.astype(w2_ref.dtype), w2_ref[...],
                  preferred_element_type=jnp.float32)
    out = out + b2_ref[...]
    o_ref[...] = out.astype(o_ref.dtype)


# ---------------------------------------------------------------------------
# Wrapper
# ---------------------------------------------------------------------------
def _pick_tile(Bp):
    """Pick batch tile (multiple of 8 / 256) given padded batch Bp."""
    if Bp <= 256:
        return Bp                                   # single small step
    if _MULTI_TC:
        # Ensure >= 2 grid steps so both TensorCores get work.
        return min(_TB_CAP, _round_up(pl.cdiv(Bp, 2), 256))
    return min(_TB_CAP, _round_up(Bp, 256))


def make_classifier(params, *, matmul_dtype=jnp.bfloat16, out_dtype=jnp.float32):
    """Prepare (cast/pad) weights once and return a jitted forward(x)."""
    D, H = params["w1"].shape
    L = params["w2"].shape[1]
    Lp = _round_up(L, 128)  # lane-dense output -> unmasked vst

    # One-time weight preparation (cached in the returned closure).
    w1 = params["w1"].astype(matmul_dtype)
    w2 = params["w2"].astype(matmul_dtype)
    if Lp != L:
        w2 = jnp.pad(w2, ((0, 0), (0, Lp - L)))
    vec = jnp.concatenate([
        params["b1"].reshape(1, H).astype(jnp.float32),
        params["gamma"].reshape(1, H).astype(jnp.float32),
        params["beta"].reshape(1, H).astype(jnp.float32),
    ], axis=0)                                   # (3, H) resident operand
    b2 = params["b2"].reshape(1, L).astype(jnp.float32)
    if Lp != L:
        b2 = jnp.pad(b2, ((0, 0), (0, Lp - L)))

    full = lambda i: (0, 0)   # resident weights/biases
    rows = lambda i: (i, 0)   # batch-tiled arrays

    if _HAS_BUFFERED:
        wspec = lambda shape: pl.BlockSpec(shape, full,
                                           pipeline_mode=pl.Buffered(1))
    else:
        wspec = lambda shape: pl.BlockSpec(shape, full)

    @jax.jit
    def forward(x):
        B = x.shape[0]
        Bp = _round_up(B, 8)
        tb = _pick_tile(Bp)
        Bp = _round_up(Bp, tb)
        grid = (Bp // tb,)

        xp = x.astype(jnp.float32)
        if Bp != B:
            xp = jnp.pad(xp, ((0, Bp - B), (0, 0)))

        # VMEM budget: ~2x actual need, capped well below physical VMEM.
        msize = jnp.dtype(matmul_dtype).itemsize
        osize = jnp.dtype(out_dtype).itemsize
        weight_bytes = (D * H + H * Lp) * msize + 3 * H * 4 + Lp * 4
        tile_bytes = 2 * tb * D * 4 + 2 * tb * Lp * osize
        act_bytes = 4 * tb * H * 4
        need = weight_bytes + tile_bytes + act_bytes
        vmem_limit = int(min(48 * 1024 * 1024,
                             max(8 * 1024 * 1024, 2 * need)))

        out = pl.pallas_call(
            classifier_kernel,
            out_shape=jax.ShapeDtypeStruct((Bp, Lp), out_dtype),
            grid=grid,
            in_specs=[
                pl.BlockSpec((tb, D), rows),   # x (batch-tiled, f32)
                wspec((D, H)),                 # w1 (bf16)
                wspec((3, H)),                 # stacked b1 / gamma / beta
                wspec((H, Lp)),                # w2 (bf16, label-padded)
                wspec((1, Lp)),                # b2 (label-padded)
            ],
            out_specs=pl.BlockSpec((tb, Lp), rows),
            compiler_params=pltpu.CompilerParams(
                dimension_semantics=("parallel",),
                vmem_limit_bytes=vmem_limit),
        )(xp, w1, vec, w2, b2)

        return out[:B, :L]

    return forward


# ---------------------------------------------------------------------------
# Parameters / reference
# ---------------------------------------------------------------------------
def init_params(key, input_dim, hidden_dim, n_labels):
    k1, k2, k3, k4 = jax.random.split(key, 4)
    # Deterministic synthetic init (roughly PyTorch-like uniform fan-in scale).
    s1 = 1.0 / jnp.sqrt(input_dim)
    s2 = 1.0 / jnp.sqrt(hidden_dim)
    return {
        "w1": jax.random.uniform(k1, (input_dim, hidden_dim), jnp.float32, -s1, s1),
        "b1": jax.random.uniform(k2, (1, hidden_dim), jnp.float32, -s1, s1),
        "gamma": jnp.ones((1, hidden_dim), jnp.float32),
        "beta": jnp.zeros((1, hidden_dim), jnp.float32),
        "w2": jax.random.uniform(k3, (hidden_dim, n_labels), jnp.float32, -s2, s2),
        "b2": jax.random.uniform(k4, (1, n_labels), jnp.float32, -s2, s2),
    }


def reference_forward(x, p, matmul_dtype=jnp.bfloat16):
    # Reference mimics the kernel's bf16 matmul operands (f32 accumulation).
    rnd = lambda a: a.astype(matmul_dtype).astype(jnp.float32)
    h = rnd(x) @ rnd(p["w1"]) + p["b1"]
    mean = jnp.mean(h, axis=-1, keepdims=True)
    var = jnp.mean((h - mean) ** 2, axis=-1, keepdims=True)
    h = (h - mean) * jax.lax.rsqrt(var + LN_EPS)
    h = h * p["gamma"] + p["beta"]
    h = jnp.maximum(h, 0.0)
    return rnd(h) @ rnd(p["w2"]) + p["b2"]


# ---------------------------------------------------------------------------
# Self-test
# ---------------------------------------------------------------------------
if __name__ == "__main__":
    key = jax.random.PRNGKey(0)
    D, H, L = 64, 256, 10   # input_dim, hidden_dim, n_labels
    kx1, kx2, kp = jax.random.split(key, 3)
    params = init_params(kp, D, H, L)
    forward = make_classifier(params)

    # Small batch (single grid step).
    B1 = 16
    x1 = jax.random.normal(kx1, (B1, D), jnp.float32)
    out1 = jax.block_until_ready(forward(x1))
    ref1 = jax.block_until_ready(reference_forward(x1, params))
    assert out1.shape == (B1, L)
    assert jnp.allclose(out1, ref1, atol=2e-2, rtol=2e-2), \
        float(jnp.max(jnp.abs(out1 - ref1)))

    # Larger, non-aligned batch (exercises padding and the multi-step grid
    # path on multi-TensorCore chips).
    B2 = 600
    x2 = jax.random.normal(kx2, (B2, D), jnp.float32)
    out2 = jax.block_until_ready(forward(x2))
    ref2 = jax.block_until_ready(reference_forward(x2, params))
    assert out2.shape == (B2, L)
    assert jnp.allclose(out2, ref2, atol=2e-2, rtol=2e-2), \
        float(jnp.max(jnp.abs(out2 - ref2)))

    print("KERNEL_OK")
</pallas_src>

<mosaic_0001>
module attributes {stable_mosaic.version = 11 : i64} {
  func.func @classifier_kernel(%arg0: i32, %arg1: memref<16x64xf32, #tpu.memory_space<vmem>>, %arg2: memref<64x256xbf16, #tpu.memory_space<vmem>>, %arg3: memref<3x256xf32, #tpu.memory_space<vmem>>, %arg4: memref<256x128xbf16, #tpu.memory_space<vmem>>, %arg5: memref<1x128xf32, #tpu.memory_space<vmem>>, %arg6: memref<16x128xf32, #tpu.memory_space<vmem>>) attributes {dimension_semantics = [#tpu.dimension_semantics<parallel>], iteration_bounds = array<i64: 1>, scalar_prefetch = 0 : i64, scratch_operands = 0 : i64, tpu.core_type = #tpu.core_type<tc>, window_params = [{transform_indices = @transform_0, window_bounds = array<i64: 16, 64>}, {pipeline_mode = #tpu.pipeline_mode<synchronous>, transform_indices = @transform_1, window_bounds = array<i64: 64, 256>}, {pipeline_mode = #tpu.pipeline_mode<synchronous>, transform_indices = @transform_2, window_bounds = array<i64: 3, 256>}, {pipeline_mode = #tpu.pipeline_mode<synchronous>, transform_indices = @transform_3, window_bounds = array<i64: 256, 128>}, {pipeline_mode = #tpu.pipeline_mode<synchronous>, transform_indices = @transform_4, window_bounds = array<i64: 1, 128>}, {transform_indices = @transform_5, window_bounds = array<i64: 16, 128>}]} {
    %c0 = arith.constant 0 : index
    %c0_0 = arith.constant 0 : index
    %0 = vector.load %arg1[%c0, %c0_0] : memref<16x64xf32, #tpu.memory_space<vmem>>, vector<16x64xf32>
    %1 = arith.truncf %0 : vector<16x64xf32> to vector<16x64xbf16>
    %c0_1 = arith.constant 0 : index
    %c0_2 = arith.constant 0 : index
    %2 = vector.load %arg2[%c0_1, %c0_2] : memref<64x256xbf16, #tpu.memory_space<vmem>>, vector<64x256xbf16>
    %cst = arith.constant dense<0.000000e+00> : vector<16x256xf32>
    %3 = tpu.matmul %1, %2, %cst {dimension_numbers = #tpu.dot_dimension_numbers<[1], [0], [0], [1], [0, 0, 1, 1], [], []>} : vector<16x64xbf16>, vector<64x256xbf16>, vector<16x256xf32> -> vector<16x256xf32>
    %c0_3 = arith.constant 0 : index
    %c0_4 = arith.constant 0 : index
    %4 = vector.load %arg3[%c0_3, %c0_4] : memref<3x256xf32, #tpu.memory_space<vmem>>, vector<1x256xf32>
    %5 = vector.broadcast %4 : vector<1x256xf32> to vector<16x256xf32>
    %6 = arith.addf %3, %5 : vector<16x256xf32>
    %cst_5 = arith.constant dense<0.000000e+00> : vector<16xf32>
    %7 = vector.multi_reduction <add>, %6, %cst_5 [1] : vector<16x256xf32> to vector<16xf32>
    %8 = vector.shape_cast %7 : vector<16xf32> to vector<16x1xf32>
    %cst_6 = arith.constant 2.560000e+02 : f32
    %9 = vector.broadcast %cst_6 : f32 to vector<16x1xf32>
    %10 = arith.divf %8, %9 : vector<16x1xf32>
    %11 = vector.broadcast %10 : vector<16x1xf32> to vector<16x256xf32>
    %12 = arith.subf %6, %11 : vector<16x256xf32>
    %13 = arith.mulf %12, %12 : vector<16x256xf32>
    %cst_7 = arith.constant dense<0.000000e+00> : vector<16xf32>
    %14 = vector.multi_reduction <add>, %13, %cst_7 [1] : vector<16x256xf32> to vector<16xf32>
    %15 = vector.shape_cast %14 : vector<16xf32> to vector<16x1xf32>
    %cst_8 = arith.constant 2.560000e+02 : f32
    %16 = vector.broadcast %cst_8 : f32 to vector<16x1xf32>
    %17 = arith.divf %15, %16 : vector<16x1xf32>
    %cst_9 = arith.constant 9.99999974E-6 : f32
    %18 = vector.broadcast %cst_9 : f32 to vector<16x1xf32>
    %19 = arith.addf %17, %18 : vector<16x1xf32>
    %20 = math.rsqrt %19 : vector<16x1xf32>
    %21 = vector.broadcast %20 : vector<16x1xf32> to vector<16x256xf32>
    %22 = arith.mulf %12, %21 : vector<16x256xf32>
    %c1 = arith.constant 1 : index
    %c0_10 = arith.constant 0 : index
    %23 = vector.load %arg3[%c1, %c0_10] : memref<3x256xf32, #tpu.memory_space<vmem>>, vector<1x256xf32>
    %24 = vector.broadcast %23 : vector<1x256xf32> to vector<16x256xf32>
    %25 = arith.mulf %22, %24 : vector<16x256xf32>
    %c2 = arith.constant 2 : index
    %c0_11 = arith.constant 0 : index
    %26 = vector.load %arg3[%c2, %c0_11] : memref<3x256xf32, #tpu.memory_space<vmem>>, vector<1x256xf32>
    %27 = vector.broadcast %26 : vector<1x256xf32> to vector<16x256xf32>
    %28 = arith.addf %25, %27 : vector<16x256xf32>
    %cst_12 = arith.constant 0.000000e+00 : f32
    %29 = vector.broadcast %cst_12 : f32 to vector<16x256xf32>
    %30 = arith.maximumf %28, %29 : vector<16x256xf32>
    %31 = arith.truncf %30 : vector<16x256xf32> to vector<16x256xbf16>
    %c0_13 = arith.constant 0 : index
    %c0_14 = arith.constant 0 : index
    %32 = vector.load %arg4[%c0_13, %c0_14] : memref<256x128xbf16, #tpu.memory_space<vmem>>, vector<256x128xbf16>
    %cst_15 = arith.constant dense<0.000000e+00> : vector<16x128xf32>
    %33 = tpu.matmul %31, %32, %cst_15 {dimension_numbers = #tpu.dot_dimension_numbers<[1], [0], [0], [1], [0, 0, 1, 1], [], []>} : vector<16x256xbf16>, vector<256x128xbf16>, vector<16x128xf32> -> vector<16x128xf32>
    %c0_16 = arith.constant 0 : index
    %c0_17 = arith.constant 0 : index
    %34 = vector.load %arg5[%c0_16, %c0_17] : memref<1x128xf32, #tpu.memory_space<vmem>>, vector<1x128xf32>
    %35 = vector.broadcast %34 : vector<1x128xf32> to vector<16x128xf32>
    %36 = arith.addf %33, %35 : vector<16x128xf32>
    %c0_18 = arith.constant 0 : index
    %c0_19 = arith.constant 0 : index
    %37 = vector.load %arg6[%c0_18, %c0_19] : memref<16x128xf32, #tpu.memory_space<vmem>>, vector<16x128xf32>
    tpu.vector_store %arg6[%c0_18, %c0_19], %36 {strides = array<i32>} : memref<16x128xf32, #tpu.memory_space<vmem>>, vector<16x128xf32>,
    return
  }
  func.func @transform_0(%arg0: i32) -> (i32, i32) {
    %c0_i32 = arith.constant 0 : i32
    %c0_i32_0 = arith.constant 0 : i32
    return %arg0, %c0_i32 : i32, i32
  }
  func.func @transform_1(%arg0: i32) -> (i32, i32) {
    %c0_i32 = arith.constant 0 : i32
    %c0_i32_0 = arith.constant 0 : i32
    %c0_i32_1 = arith.constant 0 : i32
    return %c0_i32, %c0_i32_0 : i32, i32
  }
  func.func @transform_2(%arg0: i32) -> (i32, i32) {
    %c0_i32 = arith.constant 0 : i32
    %c0_i32_0 = arith.constant 0 : i32
    %c0_i32_1 = arith.constant 0 : i32
    return %c0_i32, %c0_i32_0 : i32, i32
  }
  func.func @transform_3(%arg0: i32) -> (i32, i32) {
    %c0_i32 = arith.constant 0 : i32
    %c0_i32_0 = arith.constant 0 : i32
    %c0_i32_1 = arith.constant 0 : i32
    return %c0_i32, %c0_i32_0 : i32, i32
  }
  func.func @transform_4(%arg0: i32) -> (i32, i32) {
    %c0_i32 = arith.constant 0 : i32
    %c0_i32_0 = arith.constant 0 : i32
    %c0_i32_1 = arith.constant 0 : i32
    return %c0_i32, %c0_i32_0 : i32, i32
  }
  func.func @transform_5(%arg0: i32) -> (i32, i32) {
    %c0_i32 = arith.constant 0 : i32
    %c0_i32_0 = arith.constant 0 : i32
    return %arg0, %c0_i32 : i32, i32
  }
}

</mosaic_0001>

<bundles_post_ra>
// kernel: forward.1
= control target key start
LH: loop header
LB: loop body
LE: loop exit
PB: predicated region body
PF: predicated region fallthrough
CT: control target
= control target key end

     0   :  { %10 = vsyncpa [#allocation3], 0  ;;  %s695_s0 = inlined_call_operand.vmem [shape: f32[16,64], index: 0, kind: input, shape index: {}]   ;;  %s696_s1 = inlined_call_operand.vmem [shape: bf16[64,256], index: 1, kind: input, shape index: {}]   ;;  %s697_s2 = inlined_call_operand.hbm [shape: f32[3,256], index: 2, kind: input, shape index: {}]   ;;  %s698_s3 = inlined_call_operand.vmem [shape: bf16[256,128], index: 3, kind: input, shape index: {}]   ;;  %s699_s4 = inlined_call_operand.vmem [shape: f32[1,128], index: 4, kind: input, shape index: {}]   ;;  %s700_s5 = inlined_call_operand.hbm [shape: f32[16,128], index: 5, kind: output, shape index: {}]  }
   0x1   :  { %11 = vsyncpa [#allocation4], 0  ;;  %s545_s18 = smov [#allocation2]   ;;  %s497_s22 = scalar_lea.hbm %s697_s2, 128 }
   0x2   :  { %s22_s19 = sshll.u32 %s545_s18, 4  ;;  %p498_p0 = scmp.ne.s32.totalorder %s697_s2, %s497_s22  ;;  %s23_s19 = int_to_ptr.vmem [resolvable:$true] %s22_s19 }
   0x3   :  { %p501_p1 = scmp.lt.u32.totalorder %s497_s22, %s697_s2 }
   0x5   :  { %p503_p2 = pnand %p501_p1, %p498_p0 }
   0x7   :  { %506 = shalt.err (!%p503_p2)
}
   0x8   :  { %s507_s27 = scalar_lea.vmem %s23_s19, 128  ;;  %p512_p4 = scmp.lt.s32.totalorder %s23_s19, %s23_s19 }
   0x9   :  { %p508_p3 = scmp.ne.s32.totalorder %s23_s19, %s507_s27  ;;  %p513_p5 = scmp.lt.s32.totalorder %s507_s27, %s507_s27 }
   0xb   :  { %p514_p6 = por %p513_p5, %p512_p4 }
   0xd   :  { %p515_p7 = pnand %p514_p6, %p508_p3 }
   0xf   :  { %518 = shalt.err (!%p515_p7)
}
  0x10   :  { %25 = dma.hbm_to_vmem [thread:$0]  %s697_s2, 128, %s23_s19, [#allocation3]  }
  0x11   :  { %541 = dma.done.wait [#allocation3], 128  }
  0x12   :  { %542 = vsyncadd [#allocation3], 4294967168  ;;  %v546_v0 = vmov 0   ;;  %v465_v1 = vld [vmem:[%s696_s1 + $0x4] ss:$8 sps:$4 sm:$0xff]   ;;  %vm97_vm0 = vcmask 523264   ;;  %v47_v12 = vlaneseq }
  0x13   :  { %133 = vmatprep.mubr.bf16.mxu0 %v546_v0  ;;  %v467_v2 = vld [vmem:[%s696_s1] ss:$8 sps:$4 sm:$0xff]   ;;  %101 = vmatprep.subr.bf16.mxu0 %v465_v1  ;;  %v468_v3 = vld [vmem:[%s696_s1 + $0x14] ss:$8 sps:$4 sm:$0xff]   ;;  %v470_v4 = vld [vmem:[%s696_s1 + $0x10] ss:$8 sps:$4 sm:$0xff]  }
  0x14   :  { %102 = vmatpush1.bf16.msra.mxu0 %v467_v2  ;;  %v471_v5 = vld [vmem:[%s696_s1 + $0x24] ss:$8 sps:$4 sm:$0xff]   ;;  %v473_v6 = vld [vmem:[%s696_s1 + $0x20] ss:$8 sps:$4 sm:$0xff]   ;;  %v474_v7 = vld [vmem:[%s696_s1 + $0x34] ss:$8 sps:$4 sm:$0xff]  }
  0x15   :  { %103 = vmatprep.subr.bf16.mxu0 %v468_v3  ;;  %v476_v8 = vld [vmem:[%s696_s1 + $0x30] ss:$8 sps:$4 sm:$0xff]   ;;  %v34_v9 = vld [vmem:[%s695_s0] sm:$0xff]  ;;  %v35_v10 = vld [vmem:[%s695_s0 + $0x8] sm:$0xff]  ;;  %v48_v13 = vshrl.u32 %v47_v12, 7  ;;  %s547_s27 = smov [#allocation5]  }
  0x16   :  { %v36_v11 = vpack.c.bf16 %v35_v10, %v34_v9  ;;  %v45_v15 = vld [vmem:[#allocation2] ss:$4 sm:$0x3]  ;;  %v479_v45 = vld [vmem:[%s698_s3 + $0x48] sm:$0xff]   ;;  %v481_v47 = vld [vmem:[%s698_s3 + $0x50] sm:$0xff]   ;;  %s400_s28 = sshll.u32 %s547_s27, 4  ;;  %s401_s28 = int_to_ptr.vmem [resolvable:$true] %s400_s28 }
  0x17   :  { %v622_v14 = vsub.s32 0, %v48_v13  ;;  %v624_v16 = vsub.s32 1, %v48_v13  ;;  %v477_v29 = vld [vmem:[%s698_s3 + $0x40] sm:$0xff]   ;;  %v480_v46 = vld [vmem:[%s698_s3 + $0x8] sm:$0xff]   ;;  %v482_v48 = vld [vmem:[%s698_s3 + $0x10] sm:$0xff]   ;;  %s519_s29 = scalar_lea.vmem %s401_s28, 256  ;;  %p524_p9 = scmp.lt.s32.totalorder %s401_s28, %s401_s28 }
  0x18   :  { %104 = vmatpush1.bf16.msra.mxu0 %v470_v4  ;;  %v478_v30 = vld [vmem:[%s698_s3] sm:$0xff]   ;;  %438 = vmatprep.subr.bf16.mxu1 %v477_v29  ;;  %v483_v49 = vld [vmem:[%s698_s3 + $0x58] sm:$0xff]   ;;  %v487_v53 = vld [vmem:[%s698_s3 + $0x68] sm:$0xff]   ;;  %p520_p8 = scmp.ne.s32.totalorder %s401_s28, %s519_s29  ;;  %p525_p10 = scmp.lt.s32.totalorder %s519_s29, %s519_s29 }
  0x19   :  { %105 = vmatprep.subr.bf16.mxu0 %v471_v5  ;;  %v50_v17 = vrot.slane %v45_v15, %v622_v14  ;;  %v54_v18 = vrot.slane %v45_v15, %v624_v16  ;;  %439 = vmatpush3.bf16.msra.mxu1 %v478_v30  ;;  %v484_v50 = vld [vmem:[%s698_s3 + $0x18] sm:$0xff]   ;;  %v485_v51 = vld [vmem:[%s698_s3 + $0x60] sm:$0xff]   ;;  %v488_v54 = vld [vmem:[%s698_s3 + $0x28] sm:$0xff]  }
  0x1a   :  { %440 = vmatprep.subr.bf16.mxu1 %v479_v45  ;;  %v486_v52 = vld [vmem:[%s698_s3 + $0x20] sm:$0xff]   ;;  %v489_v55 = vld [vmem:[%s698_s3 + $0x70] sm:$0xff]   ;;  %v491_v57 = vld [vmem:[%s698_s3 + $0x78] sm:$0xff]   ;;  %p526_p11 = por %p525_p10, %p524_p9 }
  0x1b   :  { %v490_v56 = vld [vmem:[%s698_s3 + $0x30] sm:$0xff]   ;;  %v492_v58 = vld [vmem:[%s698_s3 + $0x38] sm:$0xff]   ;;  %v178_v1 = vld [vmem:[#allocation2 + $0x1] ss:$4 sm:$0x3] }
  0x1c   :  { %106 = vmatpush1.bf16.msra.mxu0 %v473_v6  ;;  %v183_v2 = vrot.slane %v178_v1, %v622_v14  ;;  %v187_v3 = vrot.slane %v178_v1, %v624_v16  ;;  %v195_v5 = vld [vmem:[#allocation2 + $0x2] ss:$4 sm:$0x3]  ;;  %p527_p12 = pnand %p526_p11, %p520_p8 }
  0x1d   :  { %107 = vmatprep.subr.bf16.mxu0 %v474_v7  ;;  %441 = vmatpush3.bf16.msra.mxu1 %v480_v46  ;;  %v200_v9 = vrot.slane %v195_v5, %v622_v14  ;;  %v204_v10 = vrot.slane %v195_v5, %v624_v16  ;;  %v421_v16 = vld [vmem:[%s699_s4] ss:$0 sm:$0xff] }
  0x1e   :  { %442 = vmatprep.subr.bf16.mxu1 %v481_v47 }
  0x20   :  { %108 = vmatpush1.bf16.msra.mxu0 %v476_v8 }
  0x21   :  { %443 = vmatpush3.bf16.msra.mxu1 %v482_v48 }
  0x22   :  { %444 = vmatprep.subr.bf16.mxu1 %v483_v49 }
  0x23   :  { %420 = vmatmul.mubr.msk.bf16.vlgmr.msra.gmra.mrb[0].mxu0 %vm97_vm0, %v36_v11 }
  0x25   :  { %445 = vmatpush3.bf16.msra.mxu1 %v484_v50 }
  0x26   :  { %446 = vmatprep.subr.bf16.mxu1 %v485_v51 }
  0x29   :  { %447 = vmatpush3.bf16.msra.mxu1 %v486_v52 }
  0x2a   :  { %448 = vmatprep.subr.bf16.mxu1 %v487_v53 }
  0x2d   :  { %449 = vmatpush3.bf16.msra.mxu1 %v488_v54 }
  0x2e   :  { %450 = vmatprep.subr.bf16.mxu1 %v489_v55 }
  0x31   :  { %451 = vmatpush3.bf16.msra.mxu1 %v490_v56 }
  0x32   :  { %452 = vmatprep.subr.bf16.mxu1 %v491_v57 }
  0x35   :  { %453 = vmatpush3.bf16.msra.mxu1 %v492_v58 }
  0xf6   :  { %v135_v19 = vpop.f32.mrb[0].mxu0 }
  0xf7   :  { %v136_v20 = vadd.f32 %v135_v19, %v50_v17  ;;  %v137_v21 = vpop.f32.mrb[1].mxu0 }
  0xf8   :  { %v138_v22 = vadd.f32 %v137_v21, %v54_v18  ;;  %v139_v23 = vpop.f32.mrb[2].mxu0 }
  0xf9   :  { %v141_v24 = vpop.f32.mrb[3].mxu0  ;;  %v140_v25 = vadd.f32 %v139_v23, %v50_v17 }
  0xfa   :  { %v142_v26 = vadd.f32 %v141_v24, %v54_v18  ;;  %v144_v27 = vadd.f32 %v138_v22, %v136_v20 }
  0xfc   :  { %145 = vadd.xlane.f32.xlu0 %v144_v27  ;;  %v147_v28 = vadd.f32 %v142_v26, %v140_v25 }
 0x100   :  { %148 = vadd.xlane.f32.xlu0 %v147_v28 }
 0x189   :  { %v146_v31 = vpop.xlane.xlu0 %145 }
 0x18a   :  { %v151_v32 = vmul.f32 0.00390625, %v146_v31 }
 0x18c   :  { %v153_v33 = vsub.f32 %v136_v20, %v151_v32  ;;  %v154_v34 = vsub.f32 %v138_v22, %v151_v32 }
 0x18d   :  { %v149_v35 = vpop.xlane.xlu0 %148 }
 0x18e   :  { %v152_v36 = vmul.f32 0.00390625, %v149_v35  ;;  %v157_v37 = vmul.f32 %v153_v33, %v153_v33  ;;  %v158_v38 = vmul.f32 %v154_v34, %v154_v34 }
 0x190   :  { %v155_v39 = vsub.f32 %v140_v25, %v152_v36  ;;  %v156_v40 = vsub.f32 %v142_v26, %v152_v36  ;;  %v161_v41 = vadd.f32 %v158_v38, %v157_v37 }
 0x192   :  { %162 = vadd.xlane.f32.xlu1 %v161_v41  ;;  %v159_v42 = vmul.f32 %v155_v39, %v155_v39  ;;  %v160_v43 = vmul.f32 %v156_v40, %v156_v40 }
 0x194   :  { %v164_v44 = vadd.f32 %v160_v43, %v159_v42 }
 0x196   :  { %165 = vadd.xlane.f32.xlu1 %v164_v44 }
 0x21f   :  { %v163_v59 = vpop.xlane.xlu1 %162 }
 0x220   :  { %v167_v60 = vmul.f32 0.00390625, %v163_v59 }
 0x222   :  { %v169_v61 = vadd.f32 1e-05, %v167_v60 }
 0x223   :  { %v166_v62 = vpop.xlane.xlu1 %165 }
 0x224   :  { %493 = vrsqrt.f32 %v169_v61  ;;  %v168_v63 = vmul.f32 0.00390625, %v166_v62 }
 0x226   :  { %v170_v0 = vadd.f32 1e-05, %v168_v63 }
 0x228   :  { %495 = vrsqrt.f32 %v170_v0 }
 0x22e   :  { %v494_v4 = vpop.eup %493 }
 0x22f   :  { %v174_v6 = vmul.f32 %v494_v4, %v154_v34  ;;  %v173_v7 = vmul.f32 %v494_v4, %v153_v33 }
 0x231   :  { %v191_v8 = vmul.f32 %v187_v3, %v174_v6  ;;  %v190_v11 = vmul.f32 %v183_v2, %v173_v7 }
 0x232   :  { %v496_v12 = vpop.eup %495 }
 0x233   :  { %v176_v13 = vmul.f32 %v496_v12, %v156_v40  ;;  %v175_v15 = vmul.f32 %v496_v12, %v155_v39  ;;  %v208_v18 = vadd.f32 %v204_v10, %v191_v8  ;;  %v207_v20 = vadd.f32 %v200_v9, %v190_v11 }
 0x235   :  { %v193_v17 = vmul.f32 %v187_v3, %v176_v13  ;;  %v192_v19 = vmul.f32 %v183_v2, %v175_v15  ;;  %v212_v23 = vmax.f32 %v208_v18, 0.0  ;;  %v211_v25 = vmax.f32 %v207_v20, 0.0 }
 0x237   :  { %v210_v21 = vadd.f32 %v204_v10, %v193_v17  ;;  %v209_v22 = vadd.f32 %v200_v9, %v192_v19 }
 0x239   :  { %v214_v24 = vmax.f32 %v210_v21, 0.0  ;;  %v213_v26 = vmax.f32 %v209_v22, 0.0 }
 0x23b   :  { %v216_v27 = vpack.c.bf16 %v214_v24, %v212_v23  ;;  %v215_v28 = vpack.c.bf16 %v213_v26, %v211_v25 }
 0x23d   :  { %384 = vmatprep.mubr.bf16.mxu1 %v216_v27 }
 0x23e   :  { %385 = vmatmul.mubr.bf16.vlgmr.msra.gmra.mrb[0].mxu1 %v215_v28 }
 0x311   :  { %v454_v14 = vpop.f32.mrb[0].mxu1 }
 0x312   :  { %v455_v29 = vpop.f32.mrb[1].mxu1 }
 0x313   :  { %v456_v30 = vadd.f32 %v455_v29, %v454_v14  ;;  %v457_v31 = vpop.f32.mrb[2].mxu1 }
 0x314   :  { %v458_v32 = vpop.f32.mrb[3].mxu1 }
 0x315   :  { %v387_v33 = vadd.f32 %v456_v30, %v421_v16  ;;  %v459_v34 = vadd.f32 %v458_v32, %v457_v31 }
 0x317   :  { %393 = vst [vmem:[#allocation5] sm:$0xff] %v387_v33  ;;  %v390_v35 = vadd.f32 %v459_v34, %v421_v16 }
 0x319   :  { %394 = vst [vmem:[#allocation5 + $0x8] sm:$0xff] %v390_v35 }
 0x31a   :  { %530 = shalt.err (!%p527_p12)
}
 0x31b   :  { %s531_s6 = scalar_lea.hbm %s700_s5, 256 }
 0x31c   :  { %p532_p13 = scmp.ne.s32.totalorder %s700_s5, %s531_s6  ;;  %p535_p0 = scmp.lt.u32.totalorder %s531_s6, %s700_s5 }
 0x31e   :  { %p537_p1 = pnand %p535_p0, %p532_p13 }
 0x320   :  { %540 = shalt.err (!%p537_p1)
}
 0x321   :  { %s548_s11 = smov 128   ;;  %s549_s2 = smov 8  }
 0x322   :  { %406 = dma.vmem_to_hbm [thread:$0]  %s401_s28, 256, %s700_s5, [#allocation4], %s548_s11, %s548_s11, %s549_s2  }
 0x323   :  { %543 = dma.done.wait [#allocation4], 256  }
 0x324   :  { %544 = vsyncadd [#allocation4], 4294967040 }
 0x325   :  { %410 = vsyncpa [#allocation3], 1 }
 0x326   :  { %411 = vsyncpa [#allocation4], 1 }

</bundles_post_ra>
